<compile_context>
chip_gen: v5e
topology: v5e:2x2
jax: 0.10.0
libtpu: 0.0.40
codegen_flags: <defaults>
</compile_context>

<pallas_src>
import jax
import jax.numpy as jnp
from jax import lax
from jax.experimental import pallas as pl
from jax.experimental.pallas import tpu as pltpu


def _gru_kernel(x_ref, h0_ref, wih_ref, whh_ref, bih_ref, bhh_ref,
                out_ref, hn_ref):
    """Whole GRU forward: input projection + serial recurrence, all in VMEM."""
    S, B, H = out_ref.shape

    w_ih = wih_ref[...]          # (3H, E)  PyTorch weight_ih_l0 layout
    w_hh = whh_ref[...]          # (3H, H)  PyTorch weight_hh_l0 layout
    b_ih = bih_ref[...]          # (1, 3H)
    b_hh = bhh_ref[...]          # (1, 3H)

    # Contract the last dim of the activations against the last dim of the
    # (out, in)-layout weights: equivalent to  a @ W.T  without a transpose op.
    dn = (((1,), (1,)), ((), ()))

    # ---- Hoisted, time-independent input projection (one matmul total) ------
    # gx[t*B:(t+1)*B, :] == x_t @ W_ih^T + b_ih, gate order (r | z | n).
    gx = lax.dot_general(x_ref[...], w_ih, dn,
                         preferred_element_type=jnp.float32) + b_ih   # (S*B, 3H)

    # ---- Serial recurrence (the only work on the critical path) -------------
    h = h0_ref[0].astype(jnp.float32)                                 # (B, H)
    for t in range(S):           # S static & tiny -> fully unrolled at trace time
        # Single fused hidden projection per step (1 MXU push instead of 3).
        gh = lax.dot_general(h, w_hh, dn,
                             preferred_element_type=jnp.float32) + b_hh  # (B, 3H)
        gi = gx[t * B:(t + 1) * B, :]                                    # (B, 3H)

        r = jax.nn.sigmoid(gi[:, 0:H] + gh[:, 0:H])
        z = jax.nn.sigmoid(gi[:, H:2 * H] + gh[:, H:2 * H])
        n = jnp.tanh(gi[:, 2 * H:3 * H] + r * gh[:, 2 * H:3 * H])
        h = (1.0 - z) * n + z * h

        # Per-step store is off the dependency chain; the vst slot has slack
        # at these shapes, so a bulk post-loop store would not move wall clock.
        out_ref[t] = h.astype(out_ref.dtype)

    hn_ref[0] = h.astype(hn_ref.dtype)   # GRU final hidden == last output step


@jax.jit
def encoder_rnn_forward(x, h0, w_ih, w_hh, b_ih, b_hh):
    """GRU forward (torch.nn.GRU semantics, gate order r, z, n).

    x    : (S, B, E)   input sequence
    h0   : (1, B, H)   initial hidden
    w_ih : (3H, E)     PyTorch weight_ih_l0
    w_hh : (3H, H)     PyTorch weight_hh_l0
    b_ih : (3H,)       PyTorch bias_ih_l0
    b_hh : (3H,)       PyTorch bias_hh_l0
    returns (output (S, B, H), hidden (1, B, H))
    """
    S, B, E = x.shape
    H = h0.shape[-1]
    f32 = jnp.float32

    # Zero-copy collapse of the leading dims (layout-identical bitcast in XLA);
    # everything else happens inside the single pallas_call.
    x2d = x.reshape(S * B, E).astype(f32)

    vmem = pl.BlockSpec(memory_space=pltpu.MemorySpace.VMEM)
    out, hn = pl.pallas_call(
        _gru_kernel,
        out_shape=(jax.ShapeDtypeStruct((S, B, H), x.dtype),
                   jax.ShapeDtypeStruct((1, B, H), x.dtype)),
        in_specs=[vmem] * 6,
        out_specs=(vmem, vmem),
    )(x2d,
      h0.astype(f32),
      w_ih.astype(f32),
      w_hh.astype(f32),
      b_ih.reshape(1, 3 * H).astype(f32),
      b_hh.reshape(1, 3 * H).astype(f32))
    return out, hn


def _gru_reference(x, h0, w_ih, w_hh, b_ih, b_hh):
    """Pure-JAX reference implementing torch.nn.GRU semantics (gate order r,z,n)."""
    H = h0.shape[-1]

    def step(h, xt):
        gi = xt @ w_ih.T + b_ih
        gh = h @ w_hh.T + b_hh
        i_r, i_z, i_n = gi[:, :H], gi[:, H:2 * H], gi[:, 2 * H:]
        h_r, h_z, h_n = gh[:, :H], gh[:, H:2 * H], gh[:, 2 * H:]
        r = jax.nn.sigmoid(i_r + h_r)
        z = jax.nn.sigmoid(i_z + h_z)
        n = jnp.tanh(i_n + r * h_n)
        h_new = (1.0 - z) * n + z * h
        return h_new, h_new

    hT, ys = jax.lax.scan(step, h0[0], x)
    return ys, hT[None]


if __name__ == "__main__":
    # Small shapes consistent with the module.
    input_embed_size = 16
    hidden_size = 32
    cond_embed_size = 8      # unused in forward()
    seq_len = 8
    batch = 2

    key = jax.random.PRNGKey(0)
    k = jax.random.split(key, 8)
    scale = 1.0 / jnp.sqrt(hidden_size)       # PyTorch GRU default init range

    # Deterministic synthetic parameters (PyTorch GRU l0 shapes).
    w_ih = jax.random.uniform(k[0], (3 * hidden_size, input_embed_size),
                              jnp.float32, -scale, scale)
    w_hh = jax.random.uniform(k[1], (3 * hidden_size, hidden_size),
                              jnp.float32, -scale, scale)
    b_ih = jax.random.uniform(k[2], (3 * hidden_size,), jnp.float32, -scale, scale)
    b_hh = jax.random.uniform(k[3], (3 * hidden_size,), jnp.float32, -scale, scale)
    # TODO(synk): linear / linearmu / linearlogvar params exist in __init__ but are
    # not used in forward(), so they are intentionally not materialized here.

    x = jax.random.normal(k[4], (seq_len, batch, input_embed_size), jnp.float32)
    h0 = jax.random.normal(k[5], (1, batch, hidden_size), jnp.float32)

    out, hn = encoder_rnn_forward(x, h0, w_ih, w_hh, b_ih, b_hh)
    out = jax.block_until_ready(out)
    hn = jax.block_until_ready(hn)

    out_ref, hn_ref = _gru_reference(x, h0, w_ih, w_hh, b_ih, b_hh)
    assert out.shape == (seq_len, batch, hidden_size)
    assert hn.shape == (1, batch, hidden_size)
    assert jnp.allclose(out, out_ref, atol=1e-5, rtol=1e-5)
    assert jnp.allclose(hn, hn_ref, atol=1e-5, rtol=1e-5)

    print("KERNEL_OK")
</pallas_src>

<mosaic_0001>
module attributes {stable_mosaic.version = 11 : i64} {
  func.func @_gru_kernel(%arg0: memref<16x16xf32, #tpu.memory_space<vmem>>, %arg1: memref<1x2x32xf32, #tpu.memory_space<vmem>>, %arg2: memref<96x16xf32, #tpu.memory_space<vmem>>, %arg3: memref<96x32xf32, #tpu.memory_space<vmem>>, %arg4: memref<1x96xf32, #tpu.memory_space<vmem>>, %arg5: memref<1x96xf32, #tpu.memory_space<vmem>>, %arg6: memref<8x2x32xf32, #tpu.memory_space<vmem>>, %arg7: memref<1x2x32xf32, #tpu.memory_space<vmem>>) attributes {dimension_semantics = [], scalar_prefetch = 0 : i64, scratch_operands = 0 : i64, tpu.core_type = #tpu.core_type<tc>} {
    %c0 = arith.constant 0 : index
    %c0_0 = arith.constant 0 : index
    %0 = vector.load %arg2[%c0, %c0_0] : memref<96x16xf32, #tpu.memory_space<vmem>>, vector<96x16xf32>
    %c0_1 = arith.constant 0 : index
    %c0_2 = arith.constant 0 : index
    %1 = vector.load %arg3[%c0_1, %c0_2] : memref<96x32xf32, #tpu.memory_space<vmem>>, vector<96x32xf32>
    %c0_3 = arith.constant 0 : index
    %c0_4 = arith.constant 0 : index
    %2 = vector.load %arg4[%c0_3, %c0_4] : memref<1x96xf32, #tpu.memory_space<vmem>>, vector<1x96xf32>
    %c0_5 = arith.constant 0 : index
    %c0_6 = arith.constant 0 : index
    %3 = vector.load %arg5[%c0_5, %c0_6] : memref<1x96xf32, #tpu.memory_space<vmem>>, vector<1x96xf32>
    %c0_7 = arith.constant 0 : index
    %c0_8 = arith.constant 0 : index
    %4 = vector.load %arg0[%c0_7, %c0_8] : memref<16x16xf32, #tpu.memory_space<vmem>>, vector<16x16xf32>
    %cst = arith.constant dense<0.000000e+00> : vector<16x96xf32>
    %5 = tpu.matmul %4, %0, %cst {dimension_numbers = #tpu.dot_dimension_numbers<[1], [1], [0], [0], [0, 0, 1, 0], [], []>} : vector<16x16xf32>, vector<96x16xf32>, vector<16x96xf32> -> vector<16x96xf32>
    %6 = vector.broadcast %2 : vector<1x96xf32> to vector<16x96xf32>
    %7 = arith.addf %5, %6 : vector<16x96xf32>
    %c0_9 = arith.constant 0 : index
    %c0_10 = arith.constant 0 : index
    %c0_11 = arith.constant 0 : index
    %8 = vector.load %arg1[%c0_9, %c0_10, %c0_11] : memref<1x2x32xf32, #tpu.memory_space<vmem>>, vector<1x2x32xf32>
    %9 = vector.shape_cast %8 : vector<1x2x32xf32> to vector<2x32xf32>
    %cst_12 = arith.constant dense<0.000000e+00> : vector<2x96xf32>
    %10 = tpu.matmul %9, %1, %cst_12 {dimension_numbers = #tpu.dot_dimension_numbers<[1], [1], [0], [0], [0, 0, 1, 0], [], []>} : vector<2x32xf32>, vector<96x32xf32>, vector<2x96xf32> -> vector<2x96xf32>
    %11 = vector.broadcast %3 : vector<1x96xf32> to vector<2x96xf32>
    %12 = arith.addf %10, %11 : vector<2x96xf32>
    %13 = vector.extract_strided_slice %7 {offsets = [0, 0], sizes = [2, 96], strides = [1, 1]} : vector<16x96xf32> to vector<2x96xf32>
    %14 = vector.extract_strided_slice %13 {offsets = [0, 0], sizes = [2, 32], strides = [1, 1]} : vector<2x96xf32> to vector<2x32xf32>
    %15 = vector.extract_strided_slice %12 {offsets = [0, 0], sizes = [2, 32], strides = [1, 1]} : vector<2x96xf32> to vector<2x32xf32>
    %16 = arith.addf %14, %15 : vector<2x32xf32>
    %17 = arith.negf %16 : vector<2x32xf32>
    %18 = math.exp %17 : vector<2x32xf32>
    %cst_13 = arith.constant 1.000000e+00 : f32
    %19 = vector.broadcast %cst_13 : f32 to vector<2x32xf32>
    %20 = arith.addf %19, %18 : vector<2x32xf32>
    %21 = arith.divf %19, %20 : vector<2x32xf32>
    %22 = vector.extract_strided_slice %13 {offsets = [0, 32], sizes = [2, 32], strides = [1, 1]} : vector<2x96xf32> to vector<2x32xf32>
    %23 = vector.extract_strided_slice %12 {offsets = [0, 32], sizes = [2, 32], strides = [1, 1]} : vector<2x96xf32> to vector<2x32xf32>
    %24 = arith.addf %22, %23 : vector<2x32xf32>
    %25 = arith.negf %24 : vector<2x32xf32>
    %26 = math.exp %25 : vector<2x32xf32>
    %cst_14 = arith.constant 1.000000e+00 : f32
    %27 = vector.broadcast %cst_14 : f32 to vector<2x32xf32>
    %28 = arith.addf %27, %26 : vector<2x32xf32>
    %29 = arith.divf %27, %28 : vector<2x32xf32>
    %30 = vector.extract_strided_slice %13 {offsets = [0, 64], sizes = [2, 32], strides = [1, 1]} : vector<2x96xf32> to vector<2x32xf32>
    %31 = vector.extract_strided_slice %12 {offsets = [0, 64], sizes = [2, 32], strides = [1, 1]} : vector<2x96xf32> to vector<2x32xf32>
    %32 = arith.mulf %21, %31 : vector<2x32xf32>
    %33 = arith.addf %30, %32 : vector<2x32xf32>
    %34 = math.tanh %33 : vector<2x32xf32>
    %cst_15 = arith.constant 1.000000e+00 : f32
    %35 = vector.broadcast %cst_15 : f32 to vector<2x32xf32>
    %36 = arith.subf %35, %29 : vector<2x32xf32>
    %37 = arith.mulf %36, %34 : vector<2x32xf32>
    %38 = arith.mulf %29, %9 : vector<2x32xf32>
    %39 = arith.addf %37, %38 : vector<2x32xf32>
    %c0_16 = arith.constant 0 : index
    %c0_17 = arith.constant 0 : index
    %c0_18 = arith.constant 0 : index
    %40 = vector.load %arg6[%c0_16, %c0_17, %c0_18] : memref<8x2x32xf32, #tpu.memory_space<vmem>>, vector<1x2x32xf32>
    %41 = vector.shape_cast %40 : vector<1x2x32xf32> to vector<2x32xf32>
    %42 = vector.shape_cast %39 : vector<2x32xf32> to vector<1x2x32xf32>
    tpu.vector_store %arg6[%c0_16, %c0_17, %c0_18], %42 {strides = array<i32>} : memref<8x2x32xf32, #tpu.memory_space<vmem>>, vector<1x2x32xf32>,
    %cst_19 = arith.constant dense<0.000000e+00> : vector<2x96xf32>
    %43 = tpu.matmul %39, %1, %cst_19 {dimension_numbers = #tpu.dot_dimension_numbers<[1], [1], [0], [0], [0, 0, 1, 0], [], []>} : vector<2x32xf32>, vector<96x32xf32>, vector<2x96xf32> -> vector<2x96xf32>
    %44 = vector.broadcast %3 : vector<1x96xf32> to vector<2x96xf32>
    %45 = arith.addf %43, %44 : vector<2x96xf32>
    %46 = vector.extract_strided_slice %7 {offsets = [2, 0], sizes = [2, 96], strides = [1, 1]} : vector<16x96xf32> to vector<2x96xf32>
    %47 = vector.extract_strided_slice %46 {offsets = [0, 0], sizes = [2, 32], strides = [1, 1]} : vector<2x96xf32> to vector<2x32xf32>
    %48 = vector.extract_strided_slice %45 {offsets = [0, 0], sizes = [2, 32], strides = [1, 1]} : vector<2x96xf32> to vector<2x32xf32>
    %49 = arith.addf %47, %48 : vector<2x32xf32>
    %50 = arith.negf %49 : vector<2x32xf32>
    %51 = math.exp %50 : vector<2x32xf32>
    %cst_20 = arith.constant 1.000000e+00 : f32
    %52 = vector.broadcast %cst_20 : f32 to vector<2x32xf32>
    %53 = arith.addf %52, %51 : vector<2x32xf32>
    %54 = arith.divf %52, %53 : vector<2x32xf32>
    %55 = vector.extract_strided_slice %46 {offsets = [0, 32], sizes = [2, 32], strides = [1, 1]} : vector<2x96xf32> to vector<2x32xf32>
    %56 = vector.extract_strided_slice %45 {offsets = [0, 32], sizes = [2, 32], strides = [1, 1]} : vector<2x96xf32> to vector<2x32xf32>
    %57 = arith.addf %55, %56 : vector<2x32xf32>
    %58 = arith.negf %57 : vector<2x32xf32>
    %59 = math.exp %58 : vector<2x32xf32>
    %cst_21 = arith.constant 1.000000e+00 : f32
    %60 = vector.broadcast %cst_21 : f32 to vector<2x32xf32>
    %61 = arith.addf %60, %59 : vector<2x32xf32>
    %62 = arith.divf %60, %61 : vector<2x32xf32>
    %63 = vector.extract_strided_slice %46 {offsets = [0, 64], sizes = [2, 32], strides = [1, 1]} : vector<2x96xf32> to vector<2x32xf32>
    %64 = vector.extract_strided_slice %45 {offsets = [0, 64], sizes = [2, 32], strides = [1, 1]} : vector<2x96xf32> to vector<2x32xf32>
    %65 = arith.mulf %54, %64 : vector<2x32xf32>
    %66 = arith.addf %63, %65 : vector<2x32xf32>
    %67 = math.tanh %66 : vector<2x32xf32>
    %cst_22 = arith.constant 1.000000e+00 : f32
    %68 = vector.broadcast %cst_22 : f32 to vector<2x32xf32>
    %69 = arith.subf %68, %62 : vector<2x32xf32>
    %70 = arith.mulf %69, %67 : vector<2x32xf32>
    %71 = arith.mulf %62, %39 : vector<2x32xf32>
    %72 = arith.addf %70, %71 : vector<2x32xf32>
    %c1 = arith.constant 1 : index
    %c0_23 = arith.constant 0 : index
    %c0_24 = arith.constant 0 : index
    %73 = vector.load %arg6[%c1, %c0_23, %c0_24] : memref<8x2x32xf32, #tpu.memory_space<vmem>>, vector<1x2x32xf32>
    %74 = vector.shape_cast %73 : vector<1x2x32xf32> to vector<2x32xf32>
    %75 = vector.shape_cast %72 : vector<2x32xf32> to vector<1x2x32xf32>
    tpu.vector_store %arg6[%c1, %c0_23, %c0_24], %75 {strides = array<i32>} : memref<8x2x32xf32, #tpu.memory_space<vmem>>, vector<1x2x32xf32>,
    %cst_25 = arith.constant dense<0.000000e+00> : vector<2x96xf32>
    %76 = tpu.matmul %72, %1, %cst_25 {dimension_numbers = #tpu.dot_dimension_numbers<[1], [1], [0], [0], [0, 0, 1, 0], [], []>} : vector<2x32xf32>, vector<96x32xf32>, vector<2x96xf32> -> vector<2x96xf32>
    %77 = vector.broadcast %3 : vector<1x96xf32> to vector<2x96xf32>
    %78 = arith.addf %76, %77 : vector<2x96xf32>
    %79 = vector.extract_strided_slice %7 {offsets = [4, 0], sizes = [2, 96], strides = [1, 1]} : vector<16x96xf32> to vector<2x96xf32>
    %80 = vector.extract_strided_slice %79 {offsets = [0, 0], sizes = [2, 32], strides = [1, 1]} : vector<2x96xf32> to vector<2x32xf32>
    %81 = vector.extract_strided_slice %78 {offsets = [0, 0], sizes = [2, 32], strides = [1, 1]} : vector<2x96xf32> to vector<2x32xf32>
    %82 = arith.addf %80, %81 : vector<2x32xf32>
    %83 = arith.negf %82 : vector<2x32xf32>
    %84 = math.exp %83 : vector<2x32xf32>
    %cst_26 = arith.constant 1.000000e+00 : f32
    %85 = vector.broadcast %cst_26 : f32 to vector<2x32xf32>
    %86 = arith.addf %85, %84 : vector<2x32xf32>
    %87 = arith.divf %85, %86 : vector<2x32xf32>
    %88 = vector.extract_strided_slice %79 {offsets = [0, 32], sizes = [2, 32], strides = [1, 1]} : vector<2x96xf32> to vector<2x32xf32>
    %89 = vector.extract_strided_slice %78 {offsets = [0, 32], sizes = [2, 32], strides = [1, 1]} : vector<2x96xf32> to vector<2x32xf32>
    %90 = arith.addf %88, %89 : vector<2x32xf32>
    %91 = arith.negf %90 : vector<2x32xf32>
    %92 = math.exp %91 : vector<2x32xf32>
    %cst_27 = arith.constant 1.000000e+00 : f32
    %93 = vector.broadcast %cst_27 : f32 to vector<2x32xf32>
    %94 = arith.addf %93, %92 : vector<2x32xf32>
    %95 = arith.divf %93, %94 : vector<2x32xf32>
    %96 = vector.extract_strided_slice %79 {offsets = [0, 64], sizes = [2, 32], strides = [1, 1]} : vector<2x96xf32> to vector<2x32xf32>
    %97 = vector.extract_strided_slice %78 {offsets = [0, 64], sizes = [2, 32], strides = [1, 1]} : vector<2x96xf32> to vector<2x32xf32>
    %98 = arith.mulf %87, %97 : vector<2x32xf32>
    %99 = arith.addf %96, %98 : vector<2x32xf32>
    %100 = math.tanh %99 : vector<2x32xf32>
    %cst_28 = arith.constant 1.000000e+00 : f32
    %101 = vector.broadcast %cst_28 : f32 to vector<2x32xf32>
    %102 = arith.subf %101, %95 : vector<2x32xf32>
    %103 = arith.mulf %102, %100 : vector<2x32xf32>
    %104 = arith.mulf %95, %72 : vector<2x32xf32>
    %105 = arith.addf %103, %104 : vector<2x32xf32>
    %c2 = arith.constant 2 : index
    %c0_29 = arith.constant 0 : index
    %c0_30 = arith.constant 0 : index
    %106 = vector.load %arg6[%c2, %c0_29, %c0_30] : memref<8x2x32xf32, #tpu.memory_space<vmem>>, vector<1x2x32xf32>
    %107 = vector.shape_cast %106 : vector<1x2x32xf32> to vector<2x32xf32>
    %108 = vector.shape_cast %105 : vector<2x32xf32> to vector<1x2x32xf32>
    tpu.vector_store %arg6[%c2, %c0_29, %c0_30], %108 {strides = array<i32>} : memref<8x2x32xf32, #tpu.memory_space<vmem>>, vector<1x2x32xf32>,
    %cst_31 = arith.constant dense<0.000000e+00> : vector<2x96xf32>
    %109 = tpu.matmul %105, %1, %cst_31 {dimension_numbers = #tpu.dot_dimension_numbers<[1], [1], [0], [0], [0, 0, 1, 0], [], []>} : vector<2x32xf32>, vector<96x32xf32>, vector<2x96xf32> -> vector<2x96xf32>
    %110 = vector.broadcast %3 : vector<1x96xf32> to vector<2x96xf32>
    %111 = arith.addf %109, %110 : vector<2x96xf32>
    %112 = vector.extract_strided_slice %7 {offsets = [6, 0], sizes = [2, 96], strides = [1, 1]} : vector<16x96xf32> to vector<2x96xf32>
    %113 = vector.extract_strided_slice %112 {offsets = [0, 0], sizes = [2, 32], strides = [1, 1]} : vector<2x96xf32> to vector<2x32xf32>
    %114 = vector.extract_strided_slice %111 {offsets = [0, 0], sizes = [2, 32], strides = [1, 1]} : vector<2x96xf32> to vector<2x32xf32>
    %115 = arith.addf %113, %114 : vector<2x32xf32>
    %116 = arith.negf %115 : vector<2x32xf32>
    %117 = math.exp %116 : vector<2x32xf32>
    %cst_32 = arith.constant 1.000000e+00 : f32
    %118 = vector.broadcast %cst_32 : f32 to vector<2x32xf32>
    %119 = arith.addf %118, %117 : vector<2x32xf32>
    %120 = arith.divf %118, %119 : vector<2x32xf32>
    %121 = vector.extract_strided_slice %112 {offsets = [0, 32], sizes = [2, 32], strides = [1, 1]} : vector<2x96xf32> to vector<2x32xf32>
    %122 = vector.extract_strided_slice %111 {offsets = [0, 32], sizes = [2, 32], strides = [1, 1]} : vector<2x96xf32> to vector<2x32xf32>
    %123 = arith.addf %121, %122 : vector<2x32xf32>
    %124 = arith.negf %123 : vector<2x32xf32>
    %125 = math.exp %124 : vector<2x32xf32>
    %cst_33 = arith.constant 1.000000e+00 : f32
    %126 = vector.broadcast %cst_33 : f32 to vector<2x32xf32>
    %127 = arith.addf %126, %125 : vector<2x32xf32>
    %128 = arith.divf %126, %127 : vector<2x32xf32>
    %129 = vector.extract_strided_slice %112 {offsets = [0, 64], sizes = [2, 32], strides = [1, 1]} : vector<2x96xf32> to vector<2x32xf32>
    %130 = vector.extract_strided_slice %111 {offsets = [0, 64], sizes = [2, 32], strides = [1, 1]} : vector<2x96xf32> to vector<2x32xf32>
    %131 = arith.mulf %120, %130 : vector<2x32xf32>
    %132 = arith.addf %129, %131 : vector<2x32xf32>
    %133 = math.tanh %132 : vector<2x32xf32>
    %cst_34 = arith.constant 1.000000e+00 : f32
    %134 = vector.broadcast %cst_34 : f32 to vector<2x32xf32>
    %135 = arith.subf %134, %128 : vector<2x32xf32>
    %136 = arith.mulf %135, %133 : vector<2x32xf32>
    %137 = arith.mulf %128, %105 : vector<2x32xf32>
    %138 = arith.addf %136, %137 : vector<2x32xf32>
    %c3 = arith.constant 3 : index
    %c0_35 = arith.constant 0 : index
    %c0_36 = arith.constant 0 : index
    %139 = vector.load %arg6[%c3, %c0_35, %c0_36] : memref<8x2x32xf32, #tpu.memory_space<vmem>>, vector<1x2x32xf32>
    %140 = vector.shape_cast %139 : vector<1x2x32xf32> to vector<2x32xf32>
    %141 = vector.shape_cast %138 : vector<2x32xf32> to vector<1x2x32xf32>
    tpu.vector_store %arg6[%c3, %c0_35, %c0_36], %141 {strides = array<i32>} : memref<8x2x32xf32, #tpu.memory_space<vmem>>, vector<1x2x32xf32>,
    %cst_37 = arith.constant dense<0.000000e+00> : vector<2x96xf32>
    %142 = tpu.matmul %138, %1, %cst_37 {dimension_numbers = #tpu.dot_dimension_numbers<[1], [1], [0], [0], [0, 0, 1, 0], [], []>} : vector<2x32xf32>, vector<96x32xf32>, vector<2x96xf32> -> vector<2x96xf32>
    %143 = vector.broadcast %3 : vector<1x96xf32> to vector<2x96xf32>
    %144 = arith.addf %142, %143 : vector<2x96xf32>
    %145 = vector.extract_strided_slice %7 {offsets = [8, 0], sizes = [2, 96], strides = [1, 1]} : vector<16x96xf32> to vector<2x96xf32>
    %146 = vector.extract_strided_slice %145 {offsets = [0, 0], sizes = [2, 32], strides = [1, 1]} : vector<2x96xf32> to vector<2x32xf32>
    %147 = vector.extract_strided_slice %144 {offsets = [0, 0], sizes = [2, 32], strides = [1, 1]} : vector<2x96xf32> to vector<2x32xf32>
    %148 = arith.addf %146, %147 : vector<2x32xf32>
    %149 = arith.negf %148 : vector<2x32xf32>
    %150 = math.exp %149 : vector<2x32xf32>
    %cst_38 = arith.constant 1.000000e+00 : f32
    %151 = vector.broadcast %cst_38 : f32 to vector<2x32xf32>
    %152 = arith.addf %151, %150 : vector<2x32xf32>
    %153 = arith.divf %151, %152 : vector<2x32xf32>
    %154 = vector.extract_strided_slice %145 {offsets = [0, 32], sizes = [2, 32], strides = [1, 1]} : vector<2x96xf32> to vector<2x32xf32>
    %155 = vector.extract_strided_slice %144 {offsets = [0, 32], sizes = [2, 32], strides = [1, 1]} : vector<2x96xf32> to vector<2x32xf32>
    %156 = arith.addf %154, %155 : vector<2x32xf32>
    %157 = arith.negf %156 : vector<2x32xf32>
    %158 = math.exp %157 : vector<2x32xf32>
    %cst_39 = arith.constant 1.000000e+00 : f32
    %159 = vector.broadcast %cst_39 : f32 to vector<2x32xf32>
    %160 = arith.addf %159, %158 : vector<2x32xf32>
    %161 = arith.divf %159, %160 : vector<2x32xf32>
    %162 = vector.extract_strided_slice %145 {offsets = [0, 64], sizes = [2, 32], strides = [1, 1]} : vector<2x96xf32> to vector<2x32xf32>
    %163 = vector.extract_strided_slice %144 {offsets = [0, 64], sizes = [2, 32], strides = [1, 1]} : vector<2x96xf32> to vector<2x32xf32>
    %164 = arith.mulf %153, %163 : vector<2x32xf32>
    %165 = arith.addf %162, %164 : vector<2x32xf32>
    %166 = math.tanh %165 : vector<2x32xf32>
    %cst_40 = arith.constant 1.000000e+00 : f32
    %167 = vector.broadcast %cst_40 : f32 to vector<2x32xf32>
    %168 = arith.subf %167, %161 : vector<2x32xf32>
    %169 = arith.mulf %168, %166 : vector<2x32xf32>
    %170 = arith.mulf %161, %138 : vector<2x32xf32>
    %171 = arith.addf %169, %170 : vector<2x32xf32>
    %c4 = arith.constant 4 : index
    %c0_41 = arith.constant 0 : index
    %c0_42 = arith.constant 0 : index
    %172 = vector.load %arg6[%c4, %c0_41, %c0_42] : memref<8x2x32xf32, #tpu.memory_space<vmem>>, vector<1x2x32xf32>
    %173 = vector.shape_cast %172 : vector<1x2x32xf32> to vector<2x32xf32>
    %174 = vector.shape_cast %171 : vector<2x32xf32> to vector<1x2x32xf32>
    tpu.vector_store %arg6[%c4, %c0_41, %c0_42], %174 {strides = array<i32>} : memref<8x2x32xf32, #tpu.memory_space<vmem>>, vector<1x2x32xf32>,
    %cst_43 = arith.constant dense<0.000000e+00> : vector<2x96xf32>
    %175 = tpu.matmul %171, %1, %cst_43 {dimension_numbers = #tpu.dot_dimension_numbers<[1], [1], [0], [0], [0, 0, 1, 0], [], []>} : vector<2x32xf32>, vector<96x32xf32>, vector<2x96xf32> -> vector<2x96xf32>
    %176 = vector.broadcast %3 : vector<1x96xf32> to vector<2x96xf32>
    %177 = arith.addf %175, %176 : vector<2x96xf32>
    %178 = vector.extract_strided_slice %7 {offsets = [10, 0], sizes = [2, 96], strides = [1, 1]} : vector<16x96xf32> to vector<2x96xf32>
    %179 = vector.extract_strided_slice %178 {offsets = [0, 0], sizes = [2, 32], strides = [1, 1]} : vector<2x96xf32> to vector<2x32xf32>
    %180 = vector.extract_strided_slice %177 {offsets = [0, 0], sizes = [2, 32], strides = [1, 1]} : vector<2x96xf32> to vector<2x32xf32>
    %181 = arith.addf %179, %180 : vector<2x32xf32>
    %182 = arith.negf %181 : vector<2x32xf32>
    %183 = math.exp %182 : vector<2x32xf32>
    %cst_44 = arith.constant 1.000000e+00 : f32
    %184 = vector.broadcast %cst_44 : f32 to vector<2x32xf32>
    %185 = arith.addf %184, %183 : vector<2x32xf32>
    %186 = arith.divf %184, %185 : vector<2x32xf32>
    %187 = vector.extract_strided_slice %178 {offsets = [0, 32], sizes = [2, 32], strides = [1, 1]} : vector<2x96xf32> to vector<2x32xf32>
    %188 = vector.extract_strided_slice %177 {offsets = [0, 32], sizes = [2, 32], strides = [1, 1]} : vector<2x96xf32> to vector<2x32xf32>
    %189 = arith.addf %187, %188 : vector<2x32xf32>
    %190 = arith.negf %189 : vector<2x32xf32>
    %191 = math.exp %190 : vector<2x32xf32>
    %cst_45 = arith.constant 1.000000e+00 : f32
    %192 = vector.broadcast %cst_45 : f32 to vector<2x32xf32>
    %193 = arith.addf %192, %191 : vector<2x32xf32>
    %194 = arith.divf %192, %193 : vector<2x32xf32>
    %195 = vector.extract_strided_slice %178 {offsets = [0, 64], sizes = [2, 32], strides = [1, 1]} : vector<2x96xf32> to vector<2x32xf32>
    %196 = vector.extract_strided_slice %177 {offsets = [0, 64], sizes = [2, 32], strides = [1, 1]} : vector<2x96xf32> to vector<2x32xf32>
    %197 = arith.mulf %186, %196 : vector<2x32xf32>
    %198 = arith.addf %195, %197 : vector<2x32xf32>
    %199 = math.tanh %198 : vector<2x32xf32>
    %cst_46 = arith.constant 1.000000e+00 : f32
    %200 = vector.broadcast %cst_46 : f32 to vector<2x32xf32>
    %201 = arith.subf %200, %194 : vector<2x32xf32>
    %202 = arith.mulf %201, %199 : vector<2x32xf32>
    %203 = arith.mulf %194, %171 : vector<2x32xf32>
    %204 = arith.addf %202, %203 : vector<2x32xf32>
    %c5 = arith.constant 5 : index
    %c0_47 = arith.constant 0 : index
    %c0_48 = arith.constant 0 : index
    %205 = vector.load %arg6[%c5, %c0_47, %c0_48] : memref<8x2x32xf32, #tpu.memory_space<vmem>>, vector<1x2x32xf32>
    %206 = vector.shape_cast %205 : vector<1x2x32xf32> to vector<2x32xf32>
    %207 = vector.shape_cast %204 : vector<2x32xf32> to vector<1x2x32xf32>
    tpu.vector_store %arg6[%c5, %c0_47, %c0_48], %207 {strides = array<i32>} : memref<8x2x32xf32, #tpu.memory_space<vmem>>, vector<1x2x32xf32>,
    %cst_49 = arith.constant dense<0.000000e+00> : vector<2x96xf32>
    %208 = tpu.matmul %204, %1, %cst_49 {dimension_numbers = #tpu.dot_dimension_numbers<[1], [1], [0], [0], [0, 0, 1, 0], [], []>} : vector<2x32xf32>, vector<96x32xf32>, vector<2x96xf32> -> vector<2x96xf32>
    %209 = vector.broadcast %3 : vector<1x96xf32> to vector<2x96xf32>
    %210 = arith.addf %208, %209 : vector<2x96xf32>
    %211 = vector.extract_strided_slice %7 {offsets = [12, 0], sizes = [2, 96], strides = [1, 1]} : vector<16x96xf32> to vector<2x96xf32>
    %212 = vector.extract_strided_slice %211 {offsets = [0, 0], sizes = [2, 32], strides = [1, 1]} : vector<2x96xf32> to vector<2x32xf32>
    %213 = vector.extract_strided_slice %210 {offsets = [0, 0], sizes = [2, 32], strides = [1, 1]} : vector<2x96xf32> to vector<2x32xf32>
    %214 = arith.addf %212, %213 : vector<2x32xf32>
    %215 = arith.negf %214 : vector<2x32xf32>
    %216 = math.exp %215 : vector<2x32xf32>
    %cst_50 = arith.constant 1.000000e+00 : f32
    %217 = vector.broadcast %cst_50 : f32 to vector<2x32xf32>
    %218 = arith.addf %217, %216 : vector<2x32xf32>
    %219 = arith.divf %217, %218 : vector<2x32xf32>
    %220 = vector.extract_strided_slice %211 {offsets = [0, 32], sizes = [2, 32], strides = [1, 1]} : vector<2x96xf32> to vector<2x32xf32>
    %221 = vector.extract_strided_slice %210 {offsets = [0, 32], sizes = [2, 32], strides = [1, 1]} : vector<2x96xf32> to vector<2x32xf32>
    %222 = arith.addf %220, %221 : vector<2x32xf32>
    %223 = arith.negf %222 : vector<2x32xf32>
    %224 = math.exp %223 : vector<2x32xf32>
    %cst_51 = arith.constant 1.000000e+00 : f32
    %225 = vector.broadcast %cst_51 : f32 to vector<2x32xf32>
    %226 = arith.addf %225, %224 : vector<2x32xf32>
    %227 = arith.divf %225, %226 : vector<2x32xf32>
    %228 = vector.extract_strided_slice %211 {offsets = [0, 64], sizes = [2, 32], strides = [1, 1]} : vector<2x96xf32> to vector<2x32xf32>
    %229 = vector.extract_strided_slice %210 {offsets = [0, 64], sizes = [2, 32], strides = [1, 1]} : vector<2x96xf32> to vector<2x32xf32>
    %230 = arith.mulf %219, %229 : vector<2x32xf32>
    %231 = arith.addf %228, %230 : vector<2x32xf32>
    %232 = math.tanh %231 : vector<2x32xf32>
    %cst_52 = arith.constant 1.000000e+00 : f32
    %233 = vector.broadcast %cst_52 : f32 to vector<2x32xf32>
    %234 = arith.subf %233, %227 : vector<2x32xf32>
    %235 = arith.mulf %234, %232 : vector<2x32xf32>
    %236 = arith.mulf %227, %204 : vector<2x32xf32>
    %237 = arith.addf %235, %236 : vector<2x32xf32>
    %c6 = arith.constant 6 : index
    %c0_53 = arith.constant 0 : index
    %c0_54 = arith.constant 0 : index
    %238 = vector.load %arg6[%c6, %c0_53, %c0_54] : memref<8x2x32xf32, #tpu.memory_space<vmem>>, vector<1x2x32xf32>
    %239 = vector.shape_cast %238 : vector<1x2x32xf32> to vector<2x32xf32>
    %240 = vector.shape_cast %237 : vector<2x32xf32> to vector<1x2x32xf32>
    tpu.vector_store %arg6[%c6, %c0_53, %c0_54], %240 {strides = array<i32>} : memref<8x2x32xf32, #tpu.memory_space<vmem>>, vector<1x2x32xf32>,
    %cst_55 = arith.constant dense<0.000000e+00> : vector<2x96xf32>
    %241 = tpu.matmul %237, %1, %cst_55 {dimension_numbers = #tpu.dot_dimension_numbers<[1], [1], [0], [0], [0, 0, 1, 0], [], []>} : vector<2x32xf32>, vector<96x32xf32>, vector<2x96xf32> -> vector<2x96xf32>
    %242 = vector.broadcast %3 : vector<1x96xf32> to vector<2x96xf32>
    %243 = arith.addf %241, %242 : vector<2x96xf32>
    %244 = vector.extract_strided_slice %7 {offsets = [14, 0], sizes = [2, 96], strides = [1, 1]} : vector<16x96xf32> to vector<2x96xf32>
    %245 = vector.extract_strided_slice %244 {offsets = [0, 0], sizes = [2, 32], strides = [1, 1]} : vector<2x96xf32> to vector<2x32xf32>
    %246 = vector.extract_strided_slice %243 {offsets = [0, 0], sizes = [2, 32], strides = [1, 1]} : vector<2x96xf32> to vector<2x32xf32>
    %247 = arith.addf %245, %246 : vector<2x32xf32>
    %248 = arith.negf %247 : vector<2x32xf32>
    %249 = math.exp %248 : vector<2x32xf32>
    %cst_56 = arith.constant 1.000000e+00 : f32
    %250 = vector.broadcast %cst_56 : f32 to vector<2x32xf32>
    %251 = arith.addf %250, %249 : vector<2x32xf32>
    %252 = arith.divf %250, %251 : vector<2x32xf32>
    %253 = vector.extract_strided_slice %244 {offsets = [0, 32], sizes = [2, 32], strides = [1, 1]} : vector<2x96xf32> to vector<2x32xf32>
    %254 = vector.extract_strided_slice %243 {offsets = [0, 32], sizes = [2, 32], strides = [1, 1]} : vector<2x96xf32> to vector<2x32xf32>
    %255 = arith.addf %253, %254 : vector<2x32xf32>
    %256 = arith.negf %255 : vector<2x32xf32>
    %257 = math.exp %256 : vector<2x32xf32>
    %cst_57 = arith.constant 1.000000e+00 : f32
    %258 = vector.broadcast %cst_57 : f32 to vector<2x32xf32>
    %259 = arith.addf %258, %257 : vector<2x32xf32>
    %260 = arith.divf %258, %259 : vector<2x32xf32>
    %261 = vector.extract_strided_slice %244 {offsets = [0, 64], sizes = [2, 32], strides = [1, 1]} : vector<2x96xf32> to vector<2x32xf32>
    %262 = vector.extract_strided_slice %243 {offsets = [0, 64], sizes = [2, 32], strides = [1, 1]} : vector<2x96xf32> to vector<2x32xf32>
    %263 = arith.mulf %252, %262 : vector<2x32xf32>
    %264 = arith.addf %261, %263 : vector<2x32xf32>
    %265 = math.tanh %264 : vector<2x32xf32>
    %cst_58 = arith.constant 1.000000e+00 : f32
    %266 = vector.broadcast %cst_58 : f32 to vector<2x32xf32>
    %267 = arith.subf %266, %260 : vector<2x32xf32>
    %268 = arith.mulf %267, %265 : vector<2x32xf32>
    %269 = arith.mulf %260, %237 : vector<2x32xf32>
    %270 = arith.addf %268, %269 : vector<2x32xf32>
    %c7 = arith.constant 7 : index
    %c0_59 = arith.constant 0 : index
    %c0_60 = arith.constant 0 : index
    %271 = vector.load %arg6[%c7, %c0_59, %c0_60] : memref<8x2x32xf32, #tpu.memory_space<vmem>>, vector<1x2x32xf32>
    %272 = vector.shape_cast %271 : vector<1x2x32xf32> to vector<2x32xf32>
    %273 = vector.shape_cast %270 : vector<2x32xf32> to vector<1x2x32xf32>
    tpu.vector_store %arg6[%c7, %c0_59, %c0_60], %273 {strides = array<i32>} : memref<8x2x32xf32, #tpu.memory_space<vmem>>, vector<1x2x32xf32>,
    %c0_61 = arith.constant 0 : index
    %c0_62 = arith.constant 0 : index
    %c0_63 = arith.constant 0 : index
    %274 = vector.load %arg7[%c0_61, %c0_62, %c0_63] : memref<1x2x32xf32, #tpu.memory_space<vmem>>, vector<1x2x32xf32>
    %275 = vector.shape_cast %274 : vector<1x2x32xf32> to vector<2x32xf32>
    %276 = vector.shape_cast %270 : vector<2x32xf32> to vector<1x2x32xf32>
    tpu.vector_store %arg7[%c0_61, %c0_62, %c0_63], %276 {strides = array<i32>} : memref<1x2x32xf32, #tpu.memory_space<vmem>>, vector<1x2x32xf32>,
    return
  }
}

</mosaic_0001>

<bundles_post_ra>
// kernel: encoder_rnn_forward.1
= control target key start
LH: loop header
LB: loop body
LE: loop exit
PB: predicated region body
PF: predicated region fallthrough
CT: control target
= control target key end

     0   :  { %13 = vsyncpa [#allocation3], 0  ;;  %vm58_vm0 = vcmask 130048   ;;  %vm128_vm1 = vcmask 261120   ;;  %s1488_s0 = inlined_call_operand.vmem [shape: f32[16,16], index: 0, kind: input, shape index: {}]   ;;  %s1489_s1 = inlined_call_operand.vmem [shape: f32[1,2,32], index: 1, kind: input, shape index: {}]   ;;  %s1490_s2 = inlined_call_operand.vmem [shape: f32[96,16], index: 2, kind: input, shape index: {}]   ;;  %s1491_s3 = inlined_call_operand.vmem [shape: f32[96,32], index: 3, kind: input, shape index: {}]   ;;  %s1492_s4 = inlined_call_operand.vmem [shape: f32[1,96], index: 4, kind: input, shape index: {}]   ;;  %s1493_s5 = inlined_call_operand.vmem [shape: f32[1,96], index: 5, kind: input, shape index: {}]   ;;  %s1494_s6 = inlined_call_operand.hbm [shape: f32[8,2,32], index: 6, kind: output, shape index: {0}]   ;;  %s1495_s7 = inlined_call_operand.hbm [shape: f32[1,2,32], index: 7, kind: output, shape index: {1}]  }
   0x1   :  { %v38_v0 = vld [vmem:[%s1490_s2 + $0x58] sm:$0xff]  ;;  %v37_v2 = vld [vmem:[%s1490_s2 + $0x50] sm:$0xff]  ;;  %v36_v4 = vld [vmem:[%s1490_s2 + $0x48] sm:$0xff] }
   0x2   :  { %v1069_v1 = vld [vmem:[%s1491_s3 + $0x58] sm:$0xff]  ;;  %783 = vmatpush.xpose.msk.msra.mxu0 %vm58_vm0, %v38_v0  ;;  %v1080_v3 = vld [vmem:[%s1491_s3 + $0x50] sm:$0xff]  ;;  %v1095_v5 = vld [vmem:[%s1491_s3 + $0x48] sm:$0xff] }
   0x3   :  { %797 = vmatpush.xpose.msk.msra.mxu1 %vm128_vm1, %v1069_v1  ;;  %811 = vmatpush.xpose.msk.msra.mxu2 %vm128_vm1, %v1069_v1 }
   0x4   :  { %825 = vmatpush.xpose.msk.msra.mxu3 %vm128_vm1, %v1069_v1 }
   0x6   :  { %784 = vmatpush.xpose.msk.msra.mxu0 %vm58_vm0, %v37_v2 }
   0x7   :  { %798 = vmatpush.xpose.msk.msra.mxu1 %vm128_vm1, %v1080_v3  ;;  %812 = vmatpush.xpose.msk.msra.mxu2 %vm128_vm1, %v1080_v3 }
   0x8   :  { %826 = vmatpush.xpose.msk.msra.mxu3 %vm128_vm1, %v1080_v3 }
   0x9   :  { %14 = vsyncpa [#allocation5], 0  ;;  %v35_v6 = vld [vmem:[%s1490_s2 + $0x40] sm:$0xff]  ;;  %v34_v8 = vld [vmem:[%s1490_s2 + $0x38] sm:$0xff]  ;;  %s1017_s29 = smov 64   ;;  %vm234_vm6 = vcmask 254976  }
   0xa   :  { %785 = vmatpush.xpose.msk.msra.mxu0 %vm58_vm0, %v36_v4  ;;  %v1110_v7 = vld [vmem:[%s1491_s3 + $0x40] sm:$0xff]  ;;  %v1125_v9 = vld [vmem:[%s1491_s3 + $0x38] sm:$0xff]  ;;  %v33_v10 = vld [vmem:[%s1490_s2 + $0x30] sm:$0xff]  ;;  %s755_s14 = sshll.u32 %s1494_s6, 4  ;;  %s1021_s15 = smov [#allocation4]   ;;  %s756_s14 = int_to_ptr.hbm [resolvable:$true] %s755_s14 }
   0xb   :  { %799 = vmatpush.xpose.msk.msra.mxu1 %vm128_vm1, %v1095_v5  ;;  %813 = vmatpush.xpose.msk.msra.mxu2 %vm128_vm1, %v1095_v5  ;;  %v1140_v11 = vld [vmem:[%s1491_s3 + $0x30] sm:$0xff]  ;;  %v32_v12 = vld [vmem:[%s1490_s2 + $0x28] sm:$0xff]  ;;  %v31_v14 = vld [vmem:[%s1490_s2 + $0x20] sm:$0xff]  ;;  %s767_s16 = sshll.u32 %s1021_s15, 4  ;;  %s769_s19 = sshll.u32 %s1495_s7, 4  ;;  %s768_s16 = int_to_ptr.vmem [resolvable:$true] %s767_s16  ;;  %s770_s19 = int_to_ptr.hbm [resolvable:$true] %s769_s19 }
   0xc   :  { %827 = vmatpush.xpose.msk.msra.mxu3 %vm128_vm1, %v1095_v5  ;;  %v1155_v13 = vld [vmem:[%s1491_s3 + $0x28] sm:$0xff]  ;;  %v1170_v15 = vld [vmem:[%s1491_s3 + $0x20] sm:$0xff]  ;;  %v30_v16 = vld [vmem:[%s1490_s2 + $0x18] sm:$0xff]  ;;  %s1022_s20 = smov 2  }
   0xd   :  { %v1185_v17 = vld [vmem:[%s1491_s3 + $0x18] sm:$0xff]  ;;  %v29_v18 = vld [vmem:[%s1490_s2 + $0x10] sm:$0xff]  ;;  %v28_v20 = vld [vmem:[%s1490_s2 + $0x8] sm:$0xff] }
   0xe   :  { %786 = vmatpush.xpose.msk.msra.mxu0 %vm58_vm0, %v35_v6  ;;  %v1200_v19 = vld [vmem:[%s1491_s3 + $0x10] sm:$0xff]  ;;  %v1215_v21 = vld [vmem:[%s1491_s3 + $0x8] sm:$0xff]  ;;  %v27_v22 = vld [vmem:[%s1490_s2] sm:$0xff] }
   0xf   :  { %800 = vmatpush.xpose.msk.msra.mxu1 %vm128_vm1, %v1110_v7  ;;  %814 = vmatpush.xpose.msk.msra.mxu2 %vm128_vm1, %v1110_v7  ;;  %v1230_v23 = vld [vmem:[%s1491_s3] sm:$0xff] }
  0x10   :  { %828 = vmatpush.xpose.msk.msra.mxu3 %vm128_vm1, %v1110_v7  ;;  %v53_v24 = vld [vmem:[%s1488_s0] sm:$0xff] }
  0x11   :  { %v1245_v25 = vld [vmem:[%s1489_s1] sm:$0x3] }
  0x12   :  { %787 = vmatpush.xpose.msk.msra.mxu0 %vm58_vm0, %v34_v8  ;;  %v1377_v26 = vld [vmem:[%s1493_s5] ss:$0 sm:$0xff]  ;;  %s1019_s5 = smov 32  }
  0x13   :  { %801 = vmatpush.xpose.msk.msra.mxu1 %vm128_vm1, %v1125_v9  ;;  %815 = vmatpush.xpose.msk.msra.mxu2 %vm128_vm1, %v1125_v9  ;;  %v1384_v29 = vld [vmem:[%s1492_s4] ss:$0 sm:$0xff]  ;;  %s1018_s4 = smov 96  }
  0x14   :  { %829 = vmatpush.xpose.msk.msra.mxu3 %vm128_vm1, %v1125_v9 }
  0x16   :  { %788 = vmatpush.xpose.msk.msra.mxu0 %vm58_vm0, %v33_v10 }
  0x17   :  { %802 = vmatpush.xpose.msk.msra.mxu1 %vm128_vm1, %v1140_v11  ;;  %816 = vmatpush.xpose.msk.msra.mxu2 %vm128_vm1, %v1140_v11 }
  0x18   :  { %830 = vmatpush.xpose.msk.msra.mxu3 %vm128_vm1, %v1140_v11 }
  0x1a   :  { %789 = vmatpush.xpose.msk.msra.mxu0 %vm58_vm0, %v32_v12 }
  0x1b   :  { %803 = vmatpush.xpose.msk.msra.mxu1 %vm128_vm1, %v1155_v13  ;;  %817 = vmatpush.xpose.msk.msra.mxu2 %vm128_vm1, %v1155_v13 }
  0x1c   :  { %831 = vmatpush.xpose.msk.msra.mxu3 %vm128_vm1, %v1155_v13 }
  0x1e   :  { %790 = vmatpush.xpose.msk.msra.mxu0 %vm58_vm0, %v31_v14 }
  0x1f   :  { %804 = vmatpush.xpose.msk.msra.mxu1 %vm128_vm1, %v1170_v15  ;;  %818 = vmatpush.xpose.msk.msra.mxu2 %vm128_vm1, %v1170_v15 }
  0x20   :  { %832 = vmatpush.xpose.msk.msra.mxu3 %vm128_vm1, %v1170_v15 }
  0x22   :  { %791 = vmatpush.xpose.msk.msra.mxu0 %vm58_vm0, %v30_v16 }
  0x23   :  { %805 = vmatpush.xpose.msk.msra.mxu1 %vm128_vm1, %v1185_v17  ;;  %819 = vmatpush.xpose.msk.msra.mxu2 %vm128_vm1, %v1185_v17 }
  0x24   :  { %833 = vmatpush.xpose.msk.msra.mxu3 %vm128_vm1, %v1185_v17 }
  0x26   :  { %792 = vmatpush.xpose.msk.msra.mxu0 %vm58_vm0, %v29_v18 }
  0x27   :  { %806 = vmatpush.xpose.msk.msra.mxu1 %vm128_vm1, %v1200_v19  ;;  %820 = vmatpush.xpose.msk.msra.mxu2 %vm128_vm1, %v1200_v19 }
  0x28   :  { %834 = vmatpush.xpose.msk.msra.mxu3 %vm128_vm1, %v1200_v19 }
  0x2a   :  { %793 = vmatpush.xpose.msk.msra.mxu0 %vm58_vm0, %v28_v20 }
  0x2b   :  { %807 = vmatpush.xpose.msk.msra.mxu1 %vm128_vm1, %v1215_v21  ;;  %821 = vmatpush.xpose.msk.msra.mxu2 %vm128_vm1, %v1215_v21 }
  0x2c   :  { %835 = vmatpush.xpose.msk.msra.mxu3 %vm128_vm1, %v1215_v21 }
  0x2e   :  { %794 = vmatpush.xpose.msk.msra.mxu0 %vm58_vm0, %v27_v22 }
  0x2f   :  { %808 = vmatpush.xpose.msk.msra.mxu1 %vm128_vm1, %v1230_v23  ;;  %822 = vmatpush.xpose.msk.msra.mxu2 %vm128_vm1, %v1230_v23 }
  0x30   :  { %836 = vmatpush.xpose.msk.msra.mxu3 %vm128_vm1, %v1230_v23 }
  0x31   :  { %795 = vmatmul.msk.f32.vlgmr.msra.gmra.mxu0 %vm58_vm0, %v53_v24 }
  0x32   :  { %839 = vmatpush.xpose.msk.msrb.mxu0 %vm128_vm1, %v1069_v1  ;;  %809 = vmatmul.msk.f32.vlgmr.msra.gmra.mxu1 %vm128_vm1, %v1245_v25 }
  0x33   :  { %853 = vmatpush.xpose.msk.msrb.mxu1 %vm128_vm1, %v1069_v1  ;;  %867 = vmatpush.xpose.msk.msrb.mxu2 %vm128_vm1, %v1069_v1 }
  0x34   :  { %881 = vmatpush.xpose.msk.msrb.mxu3 %vm128_vm1, %v1069_v1 }
  0x36   :  { %840 = vmatpush.xpose.msk.msrb.mxu0 %vm128_vm1, %v1080_v3 }
  0x37   :  { %854 = vmatpush.xpose.msk.msrb.mxu1 %vm128_vm1, %v1080_v3  ;;  %868 = vmatpush.xpose.msk.msrb.mxu2 %vm128_vm1, %v1080_v3 }
  0x38   :  { %882 = vmatpush.xpose.msk.msrb.mxu3 %vm128_vm1, %v1080_v3 }
  0x3a   :  { %841 = vmatpush.xpose.msk.msrb.mxu0 %vm128_vm1, %v1095_v5 }
  0x3b   :  { %855 = vmatpush.xpose.msk.msrb.mxu1 %vm128_vm1, %v1095_v5  ;;  %869 = vmatpush.xpose.msk.msrb.mxu2 %vm128_vm1, %v1095_v5 }
  0x3c   :  { %883 = vmatpush.xpose.msk.msrb.mxu3 %vm128_vm1, %v1095_v5 }
  0x3e   :  { %842 = vmatpush.xpose.msk.msrb.mxu0 %vm128_vm1, %v1110_v7 }
  0x3f   :  { %856 = vmatpush.xpose.msk.msrb.mxu1 %vm128_vm1, %v1110_v7  ;;  %870 = vmatpush.xpose.msk.msrb.mxu2 %vm128_vm1, %v1110_v7 }
  0x40   :  { %884 = vmatpush.xpose.msk.msrb.mxu3 %vm128_vm1, %v1110_v7 }
  0x42   :  { %843 = vmatpush.xpose.msk.msrb.mxu0 %vm128_vm1, %v1125_v9 }
  0x43   :  { %857 = vmatpush.xpose.msk.msrb.mxu1 %vm128_vm1, %v1125_v9  ;;  %871 = vmatpush.xpose.msk.msrb.mxu2 %vm128_vm1, %v1125_v9 }
  0x44   :  { %885 = vmatpush.xpose.msk.msrb.mxu3 %vm128_vm1, %v1125_v9 }
  0x46   :  { %844 = vmatpush.xpose.msk.msrb.mxu0 %vm128_vm1, %v1140_v11 }
  0x47   :  { %858 = vmatpush.xpose.msk.msrb.mxu1 %vm128_vm1, %v1140_v11  ;;  %872 = vmatpush.xpose.msk.msrb.mxu2 %vm128_vm1, %v1140_v11 }
  0x48   :  { %886 = vmatpush.xpose.msk.msrb.mxu3 %vm128_vm1, %v1140_v11 }
  0x4a   :  { %845 = vmatpush.xpose.msk.msrb.mxu0 %vm128_vm1, %v1155_v13 }
  0x4b   :  { %859 = vmatpush.xpose.msk.msrb.mxu1 %vm128_vm1, %v1155_v13  ;;  %873 = vmatpush.xpose.msk.msrb.mxu2 %vm128_vm1, %v1155_v13 }
  0x4c   :  { %887 = vmatpush.xpose.msk.msrb.mxu3 %vm128_vm1, %v1155_v13 }
  0x4e   :  { %846 = vmatpush.xpose.msk.msrb.mxu0 %vm128_vm1, %v1170_v15 }
  0x4f   :  { %860 = vmatpush.xpose.msk.msrb.mxu1 %vm128_vm1, %v1170_v15  ;;  %874 = vmatpush.xpose.msk.msrb.mxu2 %vm128_vm1, %v1170_v15 }
  0x50   :  { %888 = vmatpush.xpose.msk.msrb.mxu3 %vm128_vm1, %v1170_v15 }
  0x52   :  { %847 = vmatpush.xpose.msk.msrb.mxu0 %vm128_vm1, %v1185_v17 }
  0x53   :  { %861 = vmatpush.xpose.msk.msrb.mxu1 %vm128_vm1, %v1185_v17  ;;  %875 = vmatpush.xpose.msk.msrb.mxu2 %vm128_vm1, %v1185_v17 }
  0x54   :  { %889 = vmatpush.xpose.msk.msrb.mxu3 %vm128_vm1, %v1185_v17 }
  0x56   :  { %848 = vmatpush.xpose.msk.msrb.mxu0 %vm128_vm1, %v1200_v19 }
  0x57   :  { %862 = vmatpush.xpose.msk.msrb.mxu1 %vm128_vm1, %v1200_v19  ;;  %876 = vmatpush.xpose.msk.msrb.mxu2 %vm128_vm1, %v1200_v19 }
  0x58   :  { %890 = vmatpush.xpose.msk.msrb.mxu3 %vm128_vm1, %v1200_v19 }
  0x5a   :  { %849 = vmatpush.xpose.msk.msrb.mxu0 %vm128_vm1, %v1215_v21 }
  0x5b   :  { %863 = vmatpush.xpose.msk.msrb.mxu1 %vm128_vm1, %v1215_v21  ;;  %877 = vmatpush.xpose.msk.msrb.mxu2 %vm128_vm1, %v1215_v21 }
  0x5c   :  { %891 = vmatpush.xpose.msk.msrb.mxu3 %vm128_vm1, %v1215_v21 }
  0x5e   :  { %850 = vmatpush.xpose.msk.msrb.mxu0 %vm128_vm1, %v1230_v23 }
  0x5f   :  { %864 = vmatpush.xpose.msk.msrb.mxu1 %vm128_vm1, %v1230_v23  ;;  %878 = vmatpush.xpose.msk.msrb.mxu2 %vm128_vm1, %v1230_v23 }
  0x60   :  { %892 = vmatpush.xpose.msk.msrb.mxu3 %vm128_vm1, %v1230_v23 }
  0x62   :  { %895 = vmatpush.xpose.msk.msra.mxu0 %vm128_vm1, %v1069_v1 }
  0x66   :  { %896 = vmatpush.xpose.msk.msra.mxu0 %vm128_vm1, %v1080_v3 }
  0x6a   :  { %897 = vmatpush.xpose.msk.msra.mxu0 %vm128_vm1, %v1095_v5 }
  0x6e   :  { %898 = vmatpush.xpose.msk.msra.mxu0 %vm128_vm1, %v1110_v7 }
  0x72   :  { %899 = vmatpush.xpose.msk.msra.mxu0 %vm128_vm1, %v1125_v9 }
  0x76   :  { %900 = vmatpush.xpose.msk.msra.mxu0 %vm128_vm1, %v1140_v11 }
  0x7a   :  { %901 = vmatpush.xpose.msk.msra.mxu0 %vm128_vm1, %v1155_v13 }
  0x7e   :  { %902 = vmatpush.xpose.msk.msra.mxu0 %vm128_vm1, %v1170_v15 }
  0x82   :  { %903 = vmatpush.xpose.msk.msra.mxu0 %vm128_vm1, %v1185_v17 }
  0x86   :  { %904 = vmatpush.xpose.msk.msra.mxu0 %vm128_vm1, %v1200_v19 }
  0x8a   :  { %905 = vmatpush.xpose.msk.msra.mxu0 %vm128_vm1, %v1215_v21 }
  0x8e   :  { %906 = vmatpush.xpose.msk.msra.mxu0 %vm128_vm1, %v1230_v23 }
  0xae   :  { %v118_v30 = vpop.f32.mrf.mxu0 }
  0xaf   :  { %v185_v27 = vpop.f32.mrf.mxu1  ;;  %v1387_v31 = vadd.f32 %v1384_v29, %v118_v30 }
  0xb0   :  { %v186_v28 = vadd.f32 %v1377_v26, %v185_v27 }
  0xb2   :  { %209 = vrot.lane.b32.xlu0 %v186_v28, %s1017_s29  ;;  %v188_v32 = vadd.f32 %v186_v28, %v1387_v31 }
  0xb4   :  { %v810_v33 = vmul.f32 -1.442695, %v188_v32 }
  0xb6   :  { %917 = vpow2.f32 %v810_v33 }
  0xbc   :  { %v918_v34 = vpop.eup %917 }
  0xbd   :  { %v192_v35 = vadd.f32 1.0, %v918_v34 }
  0xbf   :  { %919 = vrcp.f32 %v192_v35  ;;  %v204_v41 = vand.u32 2147483648, %v192_v35  ;;  %vm198_vm3 = vweird.f32 %v192_v35  ;;  %v202_v42 = vand.u32 2147483647, %v192_v35 }
  0xc1   :  { %v205_v44 = vor.u32 1.1754944e-38, %v204_v41  ;;  %vm203_vm5 = vcmp.eq.f32.partialorder %v202_v42, 8.507059e+37 }
  0xc5   :  { %v920_v36 = vpop.eup %919 }
  0xc6   :  { %v194_v37 = vmul.f32 %v920_v36, %v192_v35  ;;  %vm199_vm2 = vweird.f32 %v920_v36 }
  0xc7   :  { %vm200_vm4 = vmor %vm198_vm3, %vm199_vm2 }
  0xc8   :  { %v195_v38 = vsub.f32 1.0, %v194_v37 }
  0xca   :  { %v196_v39 = vmul.f32 %v920_v36, %v195_v38 }
  0xcc   :  { %v197_v40 = vadd.f32 %v920_v36, %v196_v39 }
  0xce   :  { %v201_v43 = vsel %vm200_vm4, %v920_v36, %v197_v40 }
  0xcf   :  { %v206_v46 = vsel %vm203_vm5, %v205_v44, %v201_v43 }
  0xd0   :  { %v219_v52 = vsub.f32 1.0, %v206_v46 }
 0x124   :  { %v210_v45 = vpop.permute.xlu0 %209 }
 0x125   :  { %v212_v47 = vmul.f32 %v210_v45, %v206_v46 }
 0x127   :  { %214 = vrot.lane.b32.xlu0 %v212_v47, %s1017_s29 }
 0x199   :  { %v215_v48 = vpop.permute.xlu0 %214 }
 0x19a   :  { %v217_v49 = vadd.f32 %v215_v48, %v1387_v31 }
 0x19c   :  { %921 = vtanh.f32 %v217_v49  ;;  %v54_v49 = vld [vmem:[%s1488_s0 + $0x8] sm:$0xff]  ;;  %s1020_s0 = smov [#allocation2]  }
 0x19d   :  { %796 = vmatmul.msk.f32.gmra.mxu0 %vm58_vm0, %v54_v49  ;;  %s753_s11 = sshll.u32 %s1020_s0, 4  ;;  %s754_s11 = int_to_ptr.vmem [resolvable:$true] %s753_s11 }
 0x1a2   :  { %v922_v50 = vpop.eup %921 }
 0x1a3   :  { %221 = vrot.lane.b32.xlu1 %v922_v50, %s1018_s4 }
 0x1ab   :  { %225 = vrot.lane.b32.xlu1 %v1245_v25, %s1019_s5 }
 0x215   :  { %v222_v51 = vpop.permute.xlu1 %221 }
 0x216   :  { %v224_v54 = vmul.f32 %v222_v51, %v219_v52 }
 0x21d   :  { %v226_v53 = vpop.permute.xlu1 %225 }
 0x21e   :  { %v228_v55 = vmul.f32 %v226_v53, %v206_v46 }
 0x220   :  { %v229_v56 = vadd.f32 %v228_v55, %v224_v54 }
 0x222   :  { %231 = vrot.lane.b32.xlu2 %v229_v56, %s1018_s4  ;;  %v297_v9 = vrot.slane %v229_v56, 6 }
 0x27c   :  { %v232_v57 = vpop.permute.xlu2 %231 }
 0x27d   :  { %235 = vst.msk [vmem:[#allocation2] sm:$0x3] %vm234_vm6, %v232_v57  ;;  %823 = vmatmul.msk.f32.vlgmr.msra.gmra.mxu2 %vm128_vm1, %v232_v57 }
 0x300   :  { %v255_v58 = vpop.f32.mrf.mxu2 }
 0x301   :  { %v256_v59 = vadd.f32 %v1377_v26, %v255_v58  ;;  %v121_v58 = vpop.f32.mrf.mxu0 }
 0x303   :  { %v259_v60 = vrot.slane %v256_v59, 6 }
 0x305   :  { %v261_v61 = vadd.f32 %v259_v60, %v1387_v31  ;;  %281 = vrot.lane.b32.xlu2 %v259_v60, %s1017_s29 }
 0x307   :  { %v824_v62 = vmul.f32 -1.442695, %v261_v61 }
 0x309   :  { %923 = vpow2.f32 %v824_v62 }
 0x30f   :  { %v924_v63 = vpop.eup %923 }
 0x310   :  { %v265_v0 = vadd.f32 1.0, %v924_v63 }
 0x312   :  { %925 = vrcp.f32 %v265_v0  ;;  %v277_v4 = vand.u32 2147483648, %v265_v0  ;;  %v275_v6 = vand.u32 2147483647, %v265_v0  ;;  %vm271_vm8 = vweird.f32 %v265_v0 }
 0x314   :  { %v278_v8 = vor.u32 1.1754944e-38, %v277_v4  ;;  %vm276_vm10 = vcmp.eq.f32.partialorder %v275_v6, 8.507059e+37 }
 0x318   :  { %v926_v1 = vpop.eup %925 }
 0x319   :  { %v267_v2 = vmul.f32 %v926_v1, %v265_v0  ;;  %vm272_vm7 = vweird.f32 %v926_v1 }
 0x31a   :  { %vm273_vm9 = vmor %vm271_vm8, %vm272_vm7 }
 0x31b   :  { %v268_v3 = vsub.f32 1.0, %v267_v2 }
 0x31d   :  { %v269_v5 = vmul.f32 %v926_v1, %v268_v3 }
 0x31f   :  { %v270_v7 = vadd.f32 %v926_v1, %v269_v5 }
 0x321   :  { %v274_v10 = vsel %vm273_vm9, %v926_v1, %v270_v7 }
 0x322   :  { %v279_v11 = vsel %vm276_vm10, %v278_v8, %v274_v10 }
 0x323   :  { %v299_v12 = vmul.f32 %v297_v9, %v279_v11  ;;  %v291_v18 = vsub.f32 1.0, %v279_v11 }
 0x35f   :  { %v282_v13 = vpop.permute.xlu2 %281 }
 0x360   :  { %v284_v14 = vmul.f32 %v282_v13, %v279_v11 }
 0x362   :  { %286 = vrot.lane.b32.xlu0 %v284_v14, %s1017_s29 }
 0x3d4   :  { %v287_v15 = vpop.permute.xlu0 %286 }
 0x3d5   :  { %v289_v16 = vadd.f32 %v287_v15, %v1387_v31 }
 0x3d7   :  { %927 = vtanh.f32 %v289_v16 }
 0x3dd   :  { %v928_v17 = vpop.eup %927 }
 0x3de   :  { %293 = vrot.lane.b32.xlu1 %v928_v17, %s1018_s4 }
 0x450   :  { %v294_v19 = vpop.permute.xlu1 %293 }
 0x451   :  { %v296_v20 = vmul.f32 %v294_v19, %v291_v18 }
 0x453   :  { %v1404_v21 = vadd.f32 %v299_v12, %v296_v20 }
 0x455   :  { %v308_v22 = vrot.slane %v1404_v21, 2  ;;  %v372_v51 = vrot.slane %v1404_v21, 6 }
 0x457   :  { %309 = vrot.lane.b32.xlu2 %v308_v22, %s1018_s4 }
 0x4b1   :  { %v310_v23 = vpop.permute.xlu2 %309 }
 0x4b2   :  { %837 = vmatmul.msk.f32.vlgmr.msra.gmra.mxu3 %vm128_vm1, %v310_v23 }
 0x535   :  { %v330_v24 = vpop.f32.mrf.mxu3 }
 0x536   :  { %v331_v25 = vadd.f32 %v1377_v26, %v330_v24 }
 0x538   :  { %v334_v27 = vrot.slane %v331_v25, 4 }
 0x53a   :  { %356 = vrot.lane.b32.xlu0 %v334_v27, %s1017_s29  ;;  %v336_v28 = vadd.f32 %v334_v27, %v1387_v31 }
 0x53c   :  { %v838_v30 = vmul.f32 -1.442695, %v336_v28  ;;  %v1440_v28 = vadd.f32 %v1384_v29, %v121_v58 }
 0x53e   :  { %929 = vpow2.f32 %v838_v30 }
 0x544   :  { %v930_v32 = vpop.eup %929 }
 0x545   :  { %v340_v33 = vadd.f32 1.0, %v930_v32 }
 0x547   :  { %931 = vrcp.f32 %v340_v33  ;;  %v352_v39 = vand.u32 2147483648, %v340_v33  ;;  %vm346_vm12 = vweird.f32 %v340_v33  ;;  %v350_v40 = vand.u32 2147483647, %v340_v33 }
 0x549   :  { %v353_v42 = vor.u32 1.1754944e-38, %v352_v39  ;;  %vm351_vm14 = vcmp.eq.f32.partialorder %v350_v40, 8.507059e+37 }
 0x54d   :  { %v932_v34 = vpop.eup %931 }
 0x54e   :  { %v342_v35 = vmul.f32 %v932_v34, %v340_v33  ;;  %vm347_vm11 = vweird.f32 %v932_v34 }
 0x54f   :  { %vm348_vm13 = vmor %vm346_vm12, %vm347_vm11 }
 0x550   :  { %v343_v36 = vsub.f32 1.0, %v342_v35 }
 0x552   :  { %v344_v37 = vmul.f32 %v932_v34, %v343_v36 }
 0x554   :  { %v345_v38 = vadd.f32 %v932_v34, %v344_v37 }
 0x556   :  { %v349_v41 = vsel %vm348_vm13, %v932_v34, %v345_v38 }
 0x557   :  { %v354_v44 = vsel %vm351_vm14, %v353_v42, %v349_v41 }
 0x558   :  { %v366_v50 = vsub.f32 1.0, %v354_v44  ;;  %v374_v53 = vmul.f32 %v372_v51, %v354_v44 }
 0x5ac   :  { %v357_v43 = vpop.permute.xlu0 %356 }
 0x5ad   :  { %v359_v45 = vmul.f32 %v357_v43, %v354_v44 }
 0x5af   :  { %361 = vrot.lane.b32.xlu1 %v359_v45, %s1017_s29 }
 0x621   :  { %v362_v46 = vpop.permute.xlu1 %361 }
 0x622   :  { %v364_v47 = vadd.f32 %v362_v46, %v1387_v31 }
 0x624   :  { %933 = vtanh.f32 %v364_v47 }
 0x62a   :  { %v934_v48 = vpop.eup %933 }
 0x62b   :  { %368 = vrot.lane.b32.xlu2 %v934_v48, %s1018_s4 }
 0x685   :  { %v369_v52 = vpop.permute.xlu2 %368 }
 0x686   :  { %v371_v54 = vmul.f32 %v369_v52, %v366_v50 }
 0x688   :  { %v1420_v55 = vadd.f32 %v374_v53, %v371_v54 }
 0x68a   :  { %v383_v56 = vrot.slane %v1420_v55, 4  ;;  %v447_v18 = vrot.slane %v1420_v55, 6 }
 0x68c   :  { %384 = vrot.lane.b32.xlu0 %v383_v56, %s1018_s4 }
 0x6fe   :  { %v385_v57 = vpop.permute.xlu0 %384 }
 0x6ff   :  { %851 = vmatmul.msk.f32.vlgmr.msrb.gmra.mxu0 %vm128_vm1, %v385_v57 }
 0x77c   :  { %v405_v59 = vpop.f32.mrf.mxu0 }
 0x77d   :  { %v406_v60 = vadd.f32 %v1377_v26, %v405_v59 }
 0x77f   :  { %v409_v61 = vrot.slane %v406_v60, 2 }
 0x781   :  { %431 = vrot.lane.b32.xlu1 %v409_v61, %s1017_s29  ;;  %v411_v62 = vadd.f32 %v409_v61, %v1387_v31 }
 0x783   :  { %v852_v63 = vmul.f32 -1.442695, %v411_v62 }
 0x785   :  { %935 = vpow2.f32 %v852_v63 }
 0x78b   :  { %v936_v0 = vpop.eup %935 }
 0x78c   :  { %v415_v1 = vadd.f32 1.0, %v936_v0 }
 0x78e   :  { %937 = vrcp.f32 %v415_v1  ;;  %v427_v7 = vand.u32 2147483648, %v415_v1  ;;  %vm421_vm0 = vweird.f32 %v415_v1  ;;  %v425_v8 = vand.u32 2147483647, %v415_v1 }
 0x790   :  { %v428_v10 = vor.u32 1.1754944e-38, %v427_v7  ;;  %vm426_vm3 = vcmp.eq.f32.partialorder %v425_v8, 8.507059e+37 }
 0x794   :  { %v938_v2 = vpop.eup %937 }
 0x795   :  { %v417_v3 = vmul.f32 %v938_v2, %v415_v1  ;;  %vm422_vm15 = vweird.f32 %v938_v2 }
 0x796   :  { %vm423_vm2 = vmor %vm421_vm0, %vm422_vm15 }
 0x797   :  { %v418_v4 = vsub.f32 1.0, %v417_v3 }
 0x799   :  { %v419_v5 = vmul.f32 %v938_v2, %v418_v4 }
 0x79b   :  { %v420_v6 = vadd.f32 %v938_v2, %v419_v5 }
 0x79d   :  { %v424_v9 = vsel %vm423_vm2, %v938_v2, %v420_v6 }
 0x79e   :  { %v429_v12 = vsel %vm426_vm3, %v428_v10, %v424_v9 }
 0x79f   :  { %v441_v17 = vsub.f32 1.0, %v429_v12  ;;  %v449_v20 = vmul.f32 %v447_v18, %v429_v12 }
 0x7f3   :  { %v432_v11 = vpop.permute.xlu1 %431 }
 0x7f4   :  { %v434_v13 = vmul.f32 %v432_v11, %v429_v12 }
 0x7f6   :  { %436 = vrot.lane.b32.xlu2 %v434_v13, %s1017_s29 }
 0x850   :  { %v437_v14 = vpop.permute.xlu2 %436 }
 0x851   :  { %v439_v15 = vadd.f32 %v437_v14, %v1387_v31 }
 0x853   :  { %939 = vtanh.f32 %v439_v15 }
 0x859   :  { %v940_v16 = vpop.eup %939 }
 0x85a   :  { %443 = vrot.lane.b32.xlu0 %v940_v16, %s1018_s4 }
 0x8cc   :  { %v444_v19 = vpop.permute.xlu0 %443 }
 0x8cd   :  { %v446_v22 = vmul.f32 %v444_v19, %v441_v17 }
 0x8cf   :  { %v1432_v23 = vadd.f32 %v449_v20, %v446_v22 }
 0x8d1   :  { %v458_v24 = vrot.slane %v1432_v23, 6 }
 0x8d3   :  { %459 = vrot.lane.b32.xlu1 %v458_v24, %s1018_s4 }
 0x945   :  { %v460_v25 = vpop.permute.xlu1 %459 }
 0x946   :  { %865 = vmatmul.msk.f32.vlgmr.msrb.gmra.mxu1 %vm128_vm1, %v460_v25 }
 0x9c3   :  { %v480_v31 = vpop.f32.mrf.mxu1 }
 0x9c4   :  { %v481_v27 = vadd.f32 %v1377_v26, %v480_v31 }
 0x9c6   :  { %504 = vrot.lane.b32.xlu2 %v481_v27, %s1017_s29  ;;  %v483_v30 = vadd.f32 %v481_v27, %v1440_v28 }
 0x9c8   :  { %v866_v32 = vmul.f32 -1.442695, %v483_v30 }
 0x9ca   :  { %941 = vpow2.f32 %v866_v32 }
 0x9d0   :  { %v942_v33 = vpop.eup %941 }
 0x9d1   :  { %v487_v34 = vadd.f32 1.0, %v942_v33 }
 0x9d3   :  { %943 = vrcp.f32 %v487_v34  ;;  %v499_v40 = vand.u32 2147483648, %v487_v34  ;;  %vm493_vm5 = vweird.f32 %v487_v34  ;;  %v497_v41 = vand.u32 2147483647, %v487_v34 }
 0x9d5   :  { %v500_v29 = vor.u32 1.1754944e-38, %v499_v40  ;;  %vm498_vm8 = vcmp.eq.f32.partialorder %v497_v41, 8.507059e+37 }
 0x9d9   :  { %v944_v35 = vpop.eup %943 }
 0x9da   :  { %v489_v36 = vmul.f32 %v944_v35, %v487_v34  ;;  %vm494_vm4 = vweird.f32 %v944_v35 }
 0x9db   :  { %vm495_vm7 = vmor %vm493_vm5, %vm494_vm4  ;;  %vm306_vm4 = vcmask 257026   ;;  %vm381_vm5 = vcmask 259076  }
 0x9dc   :  { %v490_v37 = vsub.f32 1.0, %v489_v36 }
 0x9de   :  { %v491_v38 = vmul.f32 %v944_v35, %v490_v37 }
 0x9e0   :  { %v492_v39 = vadd.f32 %v944_v35, %v491_v38 }
 0x9e2   :  { %v496_v42 = vsel %vm495_vm7, %v944_v35, %v492_v39  ;;  %vm456_vm7 = vcmask 261126  }
 0x9e3   :  { %v501_v44 = vsel %vm498_vm8, %v500_v29, %v496_v42 }
 0x9e4   :  { %v514_v49 = vsub.f32 1.0, %v501_v44  ;;  %v521_v51 = vmul.f32 %v501_v44, %v458_v24 }
 0xa20   :  { %v505_v43 = vpop.permute.xlu2 %504 }
 0xa21   :  { %v507_v45 = vmul.f32 %v505_v43, %v501_v44 }
 0xa23   :  { %509 = vrot.lane.b32.xlu0 %v507_v45, %s1017_s29 }
 0xa95   :  { %v510_v46 = vpop.permute.xlu0 %509 }
 0xa96   :  { %v512_v47 = vadd.f32 %v510_v46, %v1440_v28 }
 0xa98   :  { %945 = vtanh.f32 %v512_v47 }
 0xa9e   :  { %v946_v48 = vpop.eup %945 }
 0xa9f   :  { %516 = vrot.lane.b32.xlu1 %v946_v48, %s1018_s4 }
 0xb11   :  { %v517_v50 = vpop.permute.xlu1 %516 }
 0xb12   :  { %v519_v52 = vmul.f32 %v517_v50, %v514_v49 }
 0xb14   :  { %v522_v53 = vadd.f32 %v521_v51, %v519_v52 }
 0xb16   :  { %524 = vrot.lane.b32.xlu2 %v522_v53, %s1018_s4  ;;  %v590_v14 = vrot.slane %v522_v53, 6 }
 0xb70   :  { %v525_v54 = vpop.permute.xlu2 %524 }
 0xb71   :  { %528 = vst.msk [vmem:[#allocation2 + $0x8] sm:$0x3] %vm234_vm6, %v525_v54  ;;  %879 = vmatmul.msk.f32.vlgmr.msrb.gmra.mxu2 %vm128_vm1, %v525_v54 }
 0xbf4   :  { %v548_v56 = vpop.f32.mrf.mxu2 }
 0xbf5   :  { %v549_v57 = vadd.f32 %v1377_v26, %v548_v56 }
 0xbf7   :  { %v552_v58 = vrot.slane %v549_v57, 6 }
 0xbf9   :  { %574 = vrot.lane.b32.xlu0 %v552_v58, %s1017_s29  ;;  %v554_v59 = vadd.f32 %v552_v58, %v1440_v28 }
 0xbfb   :  { %v880_v60 = vmul.f32 -1.442695, %v554_v59 }
 0xbfd   :  { %947 = vpow2.f32 %v880_v60 }
 0xc03   :  { %v948_v61 = vpop.eup %947 }
 0xc04   :  { %v558_v62 = vadd.f32 1.0, %v948_v61 }
 0xc06   :  { %949 = vrcp.f32 %v558_v62  ;;  %v570_v4 = vand.u32 2147483648, %v558_v62  ;;  %vm564_vm9 = vweird.f32 %v558_v62  ;;  %v568_v5 = vand.u32 2147483647, %v558_v62 }
 0xc08   :  { %v571_v7 = vor.u32 1.1754944e-38, %v570_v4  ;;  %vm569_vm11 = vcmp.eq.f32.partialorder %v568_v5, 8.507059e+37 }
 0xc0c   :  { %v950_v63 = vpop.eup %949 }
 0xc0d   :  { %v560_v0 = vmul.f32 %v950_v63, %v558_v62  ;;  %vm565_vm6 = vweird.f32 %v950_v63 }
 0xc0e   :  { %vm566_vm10 = vmor %vm564_vm9, %vm565_vm6 }
 0xc0f   :  { %v561_v1 = vsub.f32 1.0, %v560_v0 }
 0xc11   :  { %v562_v2 = vmul.f32 %v950_v63, %v561_v1 }
 0xc13   :  { %v563_v3 = vadd.f32 %v950_v63, %v562_v2 }
 0xc15   :  { %v567_v6 = vsel %vm566_vm10, %v950_v63, %v563_v3 }
 0xc16   :  { %v572_v9 = vsel %vm569_vm11, %v571_v7, %v567_v6 }
 0xc17   :  { %v584_v15 = vsub.f32 1.0, %v572_v9  ;;  %v592_v18 = vmul.f32 %v590_v14, %v572_v9 }
 0xc6b   :  { %v575_v8 = vpop.permute.xlu0 %574 }
 0xc6c   :  { %v577_v10 = vmul.f32 %v575_v8, %v572_v9 }
 0xc6e   :  { %579 = vrot.lane.b32.xlu1 %v577_v10, %s1017_s29 }
 0xce0   :  { %v580_v11 = vpop.permute.xlu1 %579 }
 0xce1   :  { %v582_v12 = vadd.f32 %v580_v11, %v1440_v28 }
 0xce3   :  { %951 = vtanh.f32 %v582_v12 }
 0xce9   :  { %v952_v13 = vpop.eup %951 }
 0xcea   :  { %586 = vrot.lane.b32.xlu2 %v952_v13, %s1018_s4 }
 0xd44   :  { %v587_v16 = vpop.permute.xlu2 %586 }
 0xd45   :  { %v589_v17 = vmul.f32 %v587_v16, %v584_v15 }
 0xd47   :  { %v593_v19 = vadd.f32 %v592_v18, %v589_v17 }
 0xd49   :  { %v600_v20 = vrot.slane %v593_v19, 2  ;;  %v664_v49 = vrot.slane %v593_v19, 6 }
 0xd4b   :  { %601 = vrot.lane.b32.xlu0 %v600_v20, %s1018_s4 }
 0xdbd   :  { %v602_v22 = vpop.permute.xlu0 %601 }
 0xdbe   :  { %893 = vmatmul.msk.f32.vlgmr.msrb.gmra.mxu3 %vm128_vm1, %v602_v22 }
 0xe41   :  { %v622_v24 = vpop.f32.mrf.mxu3 }
 0xe42   :  { %v623_v25 = vadd.f32 %v1377_v26, %v622_v24 }
 0xe44   :  { %v626_v31 = vrot.slane %v623_v25, 4 }
 0xe46   :  { %648 = vrot.lane.b32.xlu1 %v626_v31, %s1017_s29  ;;  %v628_v27 = vadd.f32 %v626_v31, %v1440_v28 }
 0xe48   :  { %v894_v30 = vmul.f32 -1.442695, %v628_v27 }
 0xe4a   :  { %953 = vpow2.f32 %v894_v30 }
 0xe50   :  { %v954_v32 = vpop.eup %953 }
 0xe51   :  { %v632_v33 = vadd.f32 1.0, %v954_v32 }
 0xe53   :  { %955 = vrcp.f32 %v632_v33  ;;  %v644_v39 = vand.u32 2147483648, %v632_v33  ;;  %vm638_vm13 = vweird.f32 %v632_v33  ;;  %v642_v40 = vand.u32 2147483647, %v632_v33 }
 0xe55   :  { %v645_v42 = vor.u32 1.1754944e-38, %v644_v39  ;;  %vm643_vm15 = vcmp.eq.f32.partialorder %v642_v40, 8.507059e+37 }
 0xe59   :  { %v956_v34 = vpop.eup %955 }
 0xe5a   :  { %v634_v35 = vmul.f32 %v956_v34, %v632_v33  ;;  %vm639_vm12 = vweird.f32 %v956_v34 }
 0xe5b   :  { %vm640_vm14 = vmor %vm638_vm13, %vm639_vm12 }
 0xe5c   :  { %v635_v36 = vsub.f32 1.0, %v634_v35 }
 0xe5e   :  { %v636_v37 = vmul.f32 %v956_v34, %v635_v36 }
 0xe60   :  { %v637_v38 = vadd.f32 %v956_v34, %v636_v37 }
 0xe62   :  { %v641_v41 = vsel %vm640_vm14, %v956_v34, %v637_v38 }
 0xe63   :  { %v646_v43 = vsel %vm643_vm15, %v645_v42, %v641_v41 }
 0xe64   :  { %v658_v48 = vsub.f32 1.0, %v646_v43  ;;  %v666_v51 = vmul.f32 %v664_v49, %v646_v43 }
 0xeb8   :  { %v649_v29 = vpop.permute.xlu1 %648 }
 0xeb9   :  { %v651_v44 = vmul.f32 %v649_v29, %v646_v43 }
 0xebb   :  { %653 = vrot.lane.b32.xlu2 %v651_v44, %s1017_s29 }
 0xf15   :  { %v654_v45 = vpop.permute.xlu2 %653 }
 0xf16   :  { %v656_v46 = vadd.f32 %v654_v45, %v1440_v28 }
 0xf18   :  { %957 = vtanh.f32 %v656_v46 }
 0xf1e   :  { %v958_v47 = vpop.eup %957 }
 0xf1f   :  { %660 = vrot.lane.b32.xlu0 %v958_v47, %s1018_s4 }
 0xf91   :  { %v661_v50 = vpop.permute.xlu0 %660 }
 0xf92   :  { %v663_v52 = vmul.f32 %v661_v50, %v658_v48 }
 0xf94   :  { %v667_v53 = vadd.f32 %v666_v51, %v663_v52 }
 0xf96   :  { %v674_v54 = vrot.slane %v667_v53, 4  ;;  %v738_v17 = vrot.slane %v667_v53, 6 }
 0xf98   :  { %675 = vrot.lane.b32.xlu1 %v674_v54, %s1018_s4 }
0x100a   :  { %v676_v56 = vpop.permute.xlu1 %675 }
0x100b   :  { %907 = vmatmul.msk.f32.vlgmr.msra.gmra.mxu0 %vm128_vm1, %v676_v56 }
0x1088   :  { %v696_v57 = vpop.f32.mrf.mxu0 }
0x1089   :  { %v697_v58 = vadd.f32 %v1377_v26, %v696_v57 }
0x108b   :  { %v700_v59 = vrot.slane %v697_v58, 2 }
0x108d   :  { %722 = vrot.lane.b32.xlu2 %v700_v59, %s1017_s29  ;;  %v702_v60 = vadd.f32 %v700_v59, %v1440_v28 }
0x108f   :  { %v908_v61 = vmul.f32 -1.442695, %v702_v60 }
0x1091   :  { %959 = vpow2.f32 %v908_v61 }
0x1095   :  { %302 = vrot.lane.b32.xlu2 %v1404_v21, %s1018_s4 }
0x1097   :  { %v960_v62 = vpop.eup %959 }
0x1098   :  { %v706_v63 = vadd.f32 1.0, %v960_v62 }
0x109a   :  { %961 = vrcp.f32 %v706_v63  ;;  %v718_v4 = vand.u32 2147483648, %v706_v63  ;;  %vm712_vm0 = vweird.f32 %v706_v63  ;;  %v716_v5 = vand.u32 2147483647, %v706_v63 }
0x109c   :  { %v719_v6 = vor.u32 1.1754944e-38, %v718_v4  ;;  %vm717_vm3 = vcmp.eq.f32.partialorder %v716_v5, 8.507059e+37 }
0x109d   :  { %595 = vrot.lane.b32.xlu2 %v593_v19, %s1018_s4 }
0x10a0   :  { %v962_v0 = vpop.eup %961 }
0x10a1   :  { %v708_v1 = vmul.f32 %v962_v0, %v706_v63  ;;  %vm713_vm1 = vweird.f32 %v962_v0 }
0x10a2   :  { %vm714_vm2 = vmor %vm712_vm0, %vm713_vm1 }
0x10a3   :  { %v709_v2 = vsub.f32 1.0, %v708_v1 }
0x10a5   :  { %v710_v3 = vmul.f32 %v962_v0, %v709_v2 }
0x10a7   :  { %v711_v26 = vadd.f32 %v962_v0, %v710_v3 }
0x10a9   :  { %v715_v21 = vsel %vm714_vm2, %v962_v0, %v711_v26 }
0x10aa   :  { %v720_v8 = vsel %vm717_vm3, %v719_v6, %v715_v21 }
0x10ab   :  { %v740_v19 = vmul.f32 %v738_v17, %v720_v8 }
0x10e7   :  { %v723_v7 = vpop.permute.xlu2 %722 }
0x10e8   :  { %v725_v9 = vmul.f32 %v723_v7, %v720_v8 }
0x10ea   :  { %727 = vrot.lane.b32.xlu0 %v725_v9, %s1017_s29 }
0x10ef   :  { %v303_v10 = vpop.permute.xlu2 %302 }
0x10f0   :  { %307 = vst.msk [vmem:[#allocation2] sm:$0xc] %vm306_vm4, %v303_v10 }
0x10f2   :  { %377 = vrot.lane.b32.xlu0 %v1420_v55, %s1018_s4  ;;  %v732_v55 = vsub.f32 1.0, %v720_v8 }
0x10f7   :  { %v596_v11 = vpop.permute.xlu2 %595 }
0x10f8   :  { %599 = vst.msk [vmem:[#allocation2 + $0x8] sm:$0xc] %vm306_vm4, %v596_v11 }
0x10fa   :  { %669 = vrot.lane.b32.xlu0 %v667_v53, %s1018_s4 }
0x115c   :  { %v728_v12 = vpop.permute.xlu0 %727 }
0x115d   :  { %v730_v13 = vadd.f32 %v728_v12, %v1440_v28 }
0x115f   :  { %963 = vtanh.f32 %v730_v13 }
0x1164   :  { %v378_v14 = vpop.permute.xlu0 %377 }
0x1165   :  { %v964_v15 = vpop.eup %963  ;;  %382 = vst.msk [vmem:[#allocation2] sm:$0x30] %vm381_vm5, %v378_v14 }
0x1166   :  { %734 = vrot.lane.b32.xlu1 %v964_v15, %s1018_s4 }
0x116c   :  { %v670_v16 = vpop.permute.xlu0 %669 }
0x116d   :  { %673 = vst.msk [vmem:[#allocation2 + $0x8] sm:$0x30] %vm381_vm5, %v670_v16 }
0x116e   :  { %452 = vrot.lane.b32.xlu1 %v1432_v23, %s1018_s4 }
0x11d8   :  { %v735_v18 = vpop.permute.xlu1 %734 }
0x11d9   :  { %v737_v20 = vmul.f32 %v735_v18, %v732_v55 }
0x11db   :  { %v741_v22 = vadd.f32 %v740_v19, %v737_v20 }
0x11dd   :  { %743 = vrot.lane.b32.xlu1 %v741_v22, %s1018_s4 }
0x11e0   :  { %v453_v28 = vpop.permute.xlu1 %452 }
0x11e1   :  { %457 = vst.msk [vmem:[#allocation2] sm:$0xc0] %vm456_vm7, %v453_v28 }
0x124f   :  { %v744_v23 = vpop.permute.xlu1 %743 }
0x1250   :  { %747 = vst.msk [vmem:[#allocation2 + $0x8] sm:$0xc0] %vm456_vm7, %v744_v23 }
0x1251   :  { %748 = vst.msk [vmem:[#allocation4 - $0x6] sm:$0xc0] %vm456_vm7, %v744_v23  ;;  %761 = dma.vmem_to_hbm [thread:$0]  %s754_s11, 256, %s756_s14, [#allocation3], %s1019_s5, %s1019_s5, %s1022_s20  }
0x1252   :  { %772 = dma.vmem_to_hbm [thread:$0]  %s768_s16, 32, %s770_s19, [#allocation5]  }
0x1253   :  { %1013 = dma.done.wait [#allocation3], 256  }
0x1254   :  { %1014 = vsyncadd [#allocation3], 4294967040 }
0x1255   :  { %1015 = dma.done.wait [#allocation5], 32  }
0x1256   :  { %1016 = vsyncadd [#allocation5], 4294967264 }
0x1257   :  { %781 = vsyncpa [#allocation3], 1 }
0x1258   :  { %782 = vsyncpa [#allocation5], 1 }

</bundles_post_ra>
